<compile_context>
chip_gen: v5e
topology: v5e:2x2
jax: 0.10.0
libtpu: 0.0.40
codegen_flags: <defaults>
</compile_context>

<pallas_src>
import jax
import jax.numpy as jnp
from jax.experimental import pallas as pl
from jax.experimental.pallas import tpu as pltpu

EPS = 1e-5


def _model_kernel(x_ref, p_ref, o_ref):
    # x_ref: (N, 2)   input batch
    # p_ref: (5, 8)   packed params:
    #           rows 0-1 : W.T tiled twice along features  -> (2, 8)
    #           row  2   : bias tiled twice                -> (1, 8)
    #           row  3   : batchnorm gamma (tiled)         -> (1, 8)
    #           row  4   : batchnorm beta  (tiled)         -> (1, 8)
    # o_ref: (2N, 8)  normalized flattened features, duplicated along dim 0
    n = x_ref.shape[0]
    x = x_ref[...]                                   # (N, 2)

    # Each param row is read once and used once (no repeated broadcast emission).
    wt0 = p_ref[0:1, :]                              # (1, 8)
    wt1 = p_ref[1:2, :]                              # (1, 8)
    b = p_ref[2:3, :]                                # (1, 8)
    gamma = p_ref[3:4, :]                            # (1, 8)
    beta = p_ref[4:5, :]                             # (1, 8)

    # Linear(2->4) tiled to 8 features, computed on the VPU as broadcast FMAs.
    # Equals flatten(stack((x @ W.T + b, x @ W.T + b), dim=1), start_dim=1).
    z = x[:, 0:1] * wt0 + x[:, 1:2] * wt1 + b        # (N, 8)

    # BatchNorm1d, training mode: per-feature batch stats, biased variance.
    mean = jnp.mean(z, axis=0, keepdims=True)        # (1, 8)
    centered = z - mean
    var = jnp.mean(centered * centered, axis=0, keepdims=True)

    # Fold gamma into the rsqrt factor; single FMA epilogue. rsqrt -> EUP slot.
    scale = jax.lax.rsqrt(var + EPS) * gamma         # (1, 8)
    out = centered * scale + beta                    # (N, 8)

    # In-kernel concat((x, x), dim=0): two static stores.
    o_ref[0:n, :] = out
    o_ref[n:2 * n, :] = out


def prepare_params(w, b, gamma, beta):
    """One-time parameter packing (transpose / tile / cast / concat)."""
    wt = jnp.transpose(jnp.asarray(w, jnp.float32))               # (2, 4)
    wt8 = jnp.concatenate([wt, wt], axis=1)                       # (2, 8)

    def tile8(v):
        v = jnp.asarray(v, jnp.float32).reshape(-1)
        if v.shape[0] == 4:                                       # declared (4,)
            v = jnp.concatenate([v, v], axis=0)                   # -> (8,)
        return v.reshape(1, 8)

    b8 = tile8(b)
    g8 = tile8(gamma)
    be8 = tile8(beta)
    return jnp.concatenate([wt8, b8, g8, be8], axis=0)            # (5, 8)


@jax.jit
def model_forward(x, packed_params):
    n = x.shape[0]
    out_feats = packed_params.shape[1]  # 8

    out2d = pl.pallas_call(
        _model_kernel,
        out_shape=jax.ShapeDtypeStruct((2 * n, out_feats), jnp.float32),
        in_specs=[
            pl.BlockSpec(memory_space=pltpu.MemorySpace.VMEM),
            pl.BlockSpec(memory_space=pltpu.MemorySpace.VMEM),
        ],
        out_specs=pl.BlockSpec(memory_space=pltpu.MemorySpace.VMEM),
    )(x.astype(jnp.float32), packed_params)

    # unsqueeze(1).unsqueeze(1): metadata-only reshape under jit.
    return out2d.reshape(2 * n, 1, 1, out_feats)


def _reference(x, w, b, gamma8, beta8):
    y = x @ w.T + b
    z = jnp.concatenate([y, y], axis=1)
    mean = jnp.mean(z, axis=0, keepdims=True)
    var = jnp.mean((z - mean) ** 2, axis=0, keepdims=True)
    zn = (z - mean) / jnp.sqrt(var + EPS) * gamma8 + beta8
    zn = zn[:, None, None, :]
    return jnp.concatenate([zn, zn], axis=0)


if __name__ == "__main__":
    key = jax.random.PRNGKey(0)
    kx, kw, kb = jax.random.split(key, 3)

    # Input like torch.randn(2, 2)
    x = jax.random.normal(kx, (2, 2), dtype=jnp.float32)

    # Linear(2, 4) params, deterministic init (uniform like PyTorch's default range)
    bound = 1.0 / (2.0 ** 0.5)
    w = jax.random.uniform(kw, (4, 2), minval=-bound, maxval=bound, dtype=jnp.float32)
    b = jax.random.uniform(kb, (4,), minval=-bound, maxval=bound, dtype=jnp.float32)

    # BatchNorm1d(4) affine params (PyTorch defaults: weight=1, bias=0)
    gamma = jnp.ones((4,), dtype=jnp.float32)
    beta = jnp.zeros((4,), dtype=jnp.float32)

    packed = prepare_params(w, b, gamma, beta)        # one-time prep
    out = model_forward(x, packed)
    out = jax.block_until_ready(out)

    gamma8 = jnp.concatenate([gamma, gamma]).reshape(1, 8)
    beta8 = jnp.concatenate([beta, beta]).reshape(1, 8)
    ref = _reference(x, w, b, gamma8, beta8)

    assert out.shape == (4, 1, 1, 8), out.shape
    assert jnp.allclose(out, ref, atol=1e-5, rtol=1e-5), (out, ref)

    print("KERNEL_OK")
</pallas_src>

<mosaic_0001>
module attributes {stable_mosaic.version = 11 : i64} {
  func.func @_model_kernel(%arg0: memref<2x2xf32, #tpu.memory_space<vmem>>, %arg1: memref<5x8xf32, #tpu.memory_space<vmem>>, %arg2: memref<4x8xf32, #tpu.memory_space<vmem>>) attributes {dimension_semantics = [], scalar_prefetch = 0 : i64, scratch_operands = 0 : i64, tpu.core_type = #tpu.core_type<tc>} {
    %c0 = arith.constant 0 : index
    %c0_0 = arith.constant 0 : index
    %0 = vector.load %arg0[%c0, %c0_0] : memref<2x2xf32, #tpu.memory_space<vmem>>, vector<2x2xf32>
    %c0_1 = arith.constant 0 : index
    %c0_2 = arith.constant 0 : index
    %1 = vector.load %arg1[%c0_1, %c0_2] : memref<5x8xf32, #tpu.memory_space<vmem>>, vector<1x8xf32>
    %c1 = arith.constant 1 : index
    %c0_3 = arith.constant 0 : index
    %2 = vector.load %arg1[%c1, %c0_3] : memref<5x8xf32, #tpu.memory_space<vmem>>, vector<1x8xf32>
    %c2 = arith.constant 2 : index
    %c0_4 = arith.constant 0 : index
    %3 = vector.load %arg1[%c2, %c0_4] : memref<5x8xf32, #tpu.memory_space<vmem>>, vector<1x8xf32>
    %c3 = arith.constant 3 : index
    %c0_5 = arith.constant 0 : index
    %4 = vector.load %arg1[%c3, %c0_5] : memref<5x8xf32, #tpu.memory_space<vmem>>, vector<1x8xf32>
    %c4 = arith.constant 4 : index
    %c0_6 = arith.constant 0 : index
    %5 = vector.load %arg1[%c4, %c0_6] : memref<5x8xf32, #tpu.memory_space<vmem>>, vector<1x8xf32>
    %6 = vector.extract_strided_slice %0 {offsets = [0, 0], sizes = [2, 1], strides = [1, 1]} : vector<2x2xf32> to vector<2x1xf32>
    %7 = vector.broadcast %6 : vector<2x1xf32> to vector<2x8xf32>
    %8 = vector.broadcast %1 : vector<1x8xf32> to vector<2x8xf32>
    %9 = arith.mulf %7, %8 : vector<2x8xf32>
    %10 = vector.extract_strided_slice %0 {offsets = [0, 1], sizes = [2, 1], strides = [1, 1]} : vector<2x2xf32> to vector<2x1xf32>
    %11 = vector.broadcast %10 : vector<2x1xf32> to vector<2x8xf32>
    %12 = vector.broadcast %2 : vector<1x8xf32> to vector<2x8xf32>
    %13 = arith.mulf %11, %12 : vector<2x8xf32>
    %14 = arith.addf %9, %13 : vector<2x8xf32>
    %15 = vector.broadcast %3 : vector<1x8xf32> to vector<2x8xf32>
    %16 = arith.addf %14, %15 : vector<2x8xf32>
    %cst = arith.constant dense<0.000000e+00> : vector<8xf32>
    %17 = vector.multi_reduction <add>, %16, %cst [0] : vector<2x8xf32> to vector<8xf32>
    %18 = vector.shape_cast %17 : vector<8xf32> to vector<1x8xf32>
    %cst_7 = arith.constant 2.000000e+00 : f32
    %19 = vector.broadcast %cst_7 : f32 to vector<1x8xf32>
    %20 = arith.divf %18, %19 : vector<1x8xf32>
    %21 = vector.broadcast %20 : vector<1x8xf32> to vector<2x8xf32>
    %22 = arith.subf %16, %21 : vector<2x8xf32>
    %23 = arith.mulf %22, %22 : vector<2x8xf32>
    %cst_8 = arith.constant dense<0.000000e+00> : vector<8xf32>
    %24 = vector.multi_reduction <add>, %23, %cst_8 [0] : vector<2x8xf32> to vector<8xf32>
    %25 = vector.shape_cast %24 : vector<8xf32> to vector<1x8xf32>
    %cst_9 = arith.constant 2.000000e+00 : f32
    %26 = vector.broadcast %cst_9 : f32 to vector<1x8xf32>
    %27 = arith.divf %25, %26 : vector<1x8xf32>
    %cst_10 = arith.constant 9.99999974E-6 : f32
    %28 = vector.broadcast %cst_10 : f32 to vector<1x8xf32>
    %29 = arith.addf %27, %28 : vector<1x8xf32>
    %30 = math.rsqrt %29 : vector<1x8xf32>
    %31 = arith.mulf %30, %4 : vector<1x8xf32>
    %32 = vector.broadcast %31 : vector<1x8xf32> to vector<2x8xf32>
    %33 = arith.mulf %22, %32 : vector<2x8xf32>
    %34 = vector.broadcast %5 : vector<1x8xf32> to vector<2x8xf32>
    %35 = arith.addf %33, %34 : vector<2x8xf32>
    %c0_11 = arith.constant 0 : index
    %c0_12 = arith.constant 0 : index
    %36 = vector.load %arg2[%c0_11, %c0_12] : memref<4x8xf32, #tpu.memory_space<vmem>>, vector<2x8xf32>
    tpu.vector_store %arg2[%c0_11, %c0_12], %35 {strides = array<i32>} : memref<4x8xf32, #tpu.memory_space<vmem>>, vector<2x8xf32>,
    %c2_13 = arith.constant 2 : index
    %c0_14 = arith.constant 0 : index
    %37 = vector.load %arg2[%c2_13, %c0_14] : memref<4x8xf32, #tpu.memory_space<vmem>>, vector<2x8xf32>
    tpu.vector_store %arg2[%c2_13, %c0_14], %35 {strides = array<i32>} : memref<4x8xf32, #tpu.memory_space<vmem>>, vector<2x8xf32>,
    return
  }
}

</mosaic_0001>

<bundles_post_ra>
// kernel: model_forward.1
= control target key start
LH: loop header
LB: loop body
LE: loop exit
PB: predicated region body
PF: predicated region fallthrough
CT: control target
= control target key end

     0   :  { %7 = vsyncpa [#allocation3], 0  ;;  %s252_s0 = inlined_call_operand.hbm [shape: f32[2,2], index: 0, kind: input, shape index: {}]   ;;  %s253_s1 = inlined_call_operand.hbm [shape: f32[5,8], index: 1, kind: input, shape index: {}]   ;;  %s254_s2 = inlined_call_operand.hbm [shape: f32[4,8], index: 2, kind: output, shape index: {}]  }
   0x1   :  { %8 = vsyncpa [#allocation6], 0 }
   0x2   :  { %9 = vsyncpa [#allocation4], 0  ;;  %s15_s11 = sshll.u32 %s252_s0, 4  ;;  %s218_s12 = smov [#allocation2]   ;;  %s16_s11 = int_to_ptr.hbm [resolvable:$true] %s15_s11 }
   0x3   :  { %s17_s13 = sshll.u32 %s218_s12, 4  ;;  %s26_s16 = sshll.u32 %s253_s1, 4  ;;  %s18_s13 = int_to_ptr.vmem [resolvable:$true] %s17_s13  ;;  %s27_s16 = int_to_ptr.hbm [resolvable:$true] %s26_s16 }
   0x4   :  { %20 = dma.hbm_to_vmem [thread:$0]  %s16_s11, 32, %s18_s13, [#allocation3]  }
   0x5   :  { %s219_s17 = smov [#allocation5]  }
   0x6   :  { %s28_s18 = sshll.u32 %s219_s17, 4  ;;  %s29_s18 = int_to_ptr.vmem [resolvable:$true] %s28_s18 }
   0x7   :  { %31 = dma.hbm_to_vmem [thread:$0]  %s27_s16, 128, %s29_s18, [#allocation6]  }
   0x8   :  { %212 = dma.done.wait [#allocation3], 32  }
   0x9   :  { %213 = vsyncadd [#allocation3], 4294967264 }
   0xa   :  { %214 = dma.done.wait [#allocation6], 128  }
   0xb   :  { %215 = vsyncadd [#allocation6], 4294967168  ;;  %v220_v0 = vmov 0   ;;  %v40_v1 = vld [vmem:[#allocation2] sm:$0x3]  ;;  %v221_v2 = vmov 1  }
   0xc   :  { %130 = vset.pattern.permute.xlu0 %v220_v0  ;;  %v222_v4 = vmov 2.0   ;;  %v132_v5 = vld [vmem:[#allocation5] ss:$0 sm:$0xff]  ;;  %v133_v6 = vld [vmem:[#allocation5 + $0x1] ss:$0 sm:$0xff]  ;;  %vm62_vm0 = vcmask 58368  }
   0xd   :  { %48 = vperm.xlu0 %130, %v40_v1   ;;  %136 = vrcp.f32 %v222_v4  ;;  %v134_v10 = vld [vmem:[#allocation5 + $0x2] ss:$0 sm:$0xff]  ;;  %v44_v43 = vld [vmem:[#allocation5 + $0x3] sm:$0x1]  ;;  %v135_v48 = vld [vmem:[#allocation5 + $0x4] ss:$0 sm:$0xff] }
   0xe   :  { %s223_s0 = smov [#allocation7]   ;;  %s113_s21 = sshll.u32 %s254_s2, 4  ;;  %s114_s21 = int_to_ptr.hbm [resolvable:$true] %s113_s21 }
   0xf   :  { %s111_s1 = sshll.u32 %s223_s0, 4  ;;  %s112_s1 = int_to_ptr.vmem [resolvable:$true] %s111_s1 }
  0x13   :  { %v137_v7 = vpop.eup %136 }
  0x14   :  { %v71_v11 = vmul.f32 2.0, %v137_v7  ;;  %vm75_vm1 = vweird.f32 %v137_v7 }
  0x15   :  { %131 = vset.pattern.permute.xlu0 %v221_v2 }
  0x16   :  { %54 = vperm.xlu0 %131, %v40_v1   ;;  %v72_v14 = vsub.f32 1.0, %v71_v11 }
  0x18   :  { %v73_v18 = vmul.f32 %v137_v7, %v72_v14 }
  0x1a   :  { %v74_v21 = vadd.f32 %v137_v7, %v73_v18 }
  0x1c   :  { %v76_v24 = vsel %vm75_vm1, %v137_v7, %v74_v21 }
  0x7f   :  { %v49_v3 = vpop.permute.xlu0 %48 }
  0x80   :  { %v52_v9 = vmul.f32 %v132_v5, %v49_v3 }
  0x88   :  { %v55_v8 = vpop.permute.xlu0 %54 }
  0x89   :  { %v58_v12 = vmul.f32 %v133_v6, %v55_v8 }
  0x8b   :  { %v59_v13 = vadd.f32 %v58_v12, %v52_v9 }
  0x8d   :  { %v61_v15 = vadd.f32 %v134_v10, %v59_v13 }
  0x8f   :  { %v63_v16 = vsel %vm62_vm0, %v61_v15, 0.0 }
  0x90   :  { %v64_v17 = vrot.slane %v63_v16, 4 }
  0x92   :  { %v65_v19 = vadd.f32 %v64_v17, %v63_v16 }
  0x94   :  { %v66_v20 = vrot.slane %v65_v19, 2 }
  0x96   :  { %v67_v22 = vadd.f32 %v66_v20, %v65_v19 }
  0x98   :  { %v68_v23 = vrot.slane %v67_v22, 1 }
  0x9a   :  { %v69_v25 = vadd.f32 %v68_v23, %v67_v22 }
  0x9c   :  { %v77_v26 = vmul.f32 %v76_v24, %v69_v25 }
  0x9e   :  { %v78_v27 = vsub.f32 %v61_v15, %v77_v26 }
  0xa0   :  { %v79_v28 = vmul.f32 %v78_v27, %v78_v27 }
  0xa2   :  { %v80_v29 = vsel %vm62_vm0, %v79_v28, 0.0 }
  0xa3   :  { %v81_v30 = vrot.slane %v80_v29, 4 }
  0xa5   :  { %v82_v31 = vadd.f32 %v81_v30, %v80_v29 }
  0xa7   :  { %v83_v32 = vrot.slane %v82_v31, 2 }
  0xa9   :  { %v84_v33 = vadd.f32 %v83_v32, %v82_v31 }
  0xab   :  { %v85_v34 = vrot.slane %v84_v33, 1 }
  0xad   :  { %v86_v35 = vadd.f32 %v85_v34, %v84_v33 }
  0xaf   :  { %v87_v36 = vmul.f32 %v86_v35, %v76_v24 }
  0xb1   :  { %v88_v37 = vadd.f32 1e-05, %v87_v36 }
  0xb3   :  { %138 = vrsqrt.f32 %v88_v37  ;;  %vm95_vm3 = vweird.f32 %v88_v37 }
  0xb9   :  { %v139_v38 = vpop.eup %138 }
  0xba   :  { %v90_v39 = vmul.f32 %v139_v38, %v88_v37  ;;  %vm96_vm2 = vweird.f32 %v139_v38 }
  0xbb   :  { %vm97_vm4 = vmor %vm95_vm3, %vm96_vm2 }
  0xbc   :  { %v91_v40 = vmul.f32 %v139_v38, %v90_v39 }
  0xbe   :  { %v92_v41 = vmul.f32 0.5, %v91_v40 }
  0xc0   :  { %v93_v42 = vsub.f32 1.5, %v92_v41 }
  0xc2   :  { %v94_v44 = vmul.f32 %v139_v38, %v93_v42 }
  0xc4   :  { %v98_v45 = vsel %vm97_vm4, %v139_v38, %v94_v44 }
  0xc5   :  { %v99_v46 = vmul.f32 %v98_v45, %v44_v43 }
  0xc7   :  { %v100_v47 = vperm.slane %v99_v46, 0 }
  0xc9   :  { %v101_v49 = vmul.f32 %v100_v47, %v78_v27 }
  0xcb   :  { %v103_v50 = vadd.f32 %v135_v48, %v101_v49 }
  0xcd   :  { %104 = vst.msk [vmem:[#allocation7] sm:$0x3] %vm62_vm0, %v103_v50 }
  0xce   :  { %105 = vst.msk [vmem:[#allocation7 + $0x2] sm:$0x3] %vm62_vm0, %v103_v50 }
  0xcf   :  { %116 = dma.vmem_to_hbm [thread:$0]  %s112_s1, 64, %s114_s21, [#allocation4]  }
  0xd0   :  { %216 = dma.done.wait [#allocation4], 64  }
  0xd1   :  { %217 = vsyncadd [#allocation4], 4294967232 }
  0xd2   :  { %121 = vsyncpa [#allocation3], 1 }
  0xd3   :  { %122 = vsyncpa [#allocation6], 1 }
  0xd4   :  { %123 = vsyncpa [#allocation4], 1 }

</bundles_post_ra>
